<compile_context>
chip_gen: v5e
topology: v5e:2x2
jax: 0.10.0
libtpu: 0.0.40
codegen_flags: <defaults>
</compile_context>

<pallas_src>
import jax
import jax.numpy as jnp
from jax.experimental import pallas as pl
from jax.experimental.pallas import tpu as pltpu

_LANES = 128


def _freq_attn_kernel(x_ref, w_ref, b_ref, o_ref):
    """x_ref: (B_tile, n_rows, L); w_ref: (L, L); b_ref: (1, L); o_ref: like x_ref."""
    x = x_ref[...].astype(jnp.float32)                 # (B_tile, n_rows, L)

    # Sum over the flattened (C*T)/reps rows -> (B_tile, L). Kept 2D.
    col_sum = jnp.sum(x, axis=1)                       # (B_tile, L)

    # Folded mean + Linear + lane-replication: one tiny MXU matmul.
    lin = jnp.dot(col_sum, w_ref[...],
                  preferred_element_type=jnp.float32) + b_ref[...]
    attn = 1.0 / (1.0 + jnp.exp(-lin))                 # sigmoid, (B_tile, L)

    # Broadcast multiply over rows; full-width (128-lane) stores.
    o_ref[...] = (x * attn[:, None, :]).astype(o_ref.dtype)


def _largest_divisor_le(n, cap):
    cap = max(1, min(n, cap))
    for d in range(cap, 0, -1):
        if n % d == 0:
            return d
    return 1


def freq_attn(x, weight, bias, *, block_bytes_cap=4 * 1024 * 1024):
    """x: (B, C, T, F) float; weight: (F, F) torch-Linear weight (y = x @ W^T + b); bias: (F,)."""
    B, C, T, F = x.shape
    assert weight.shape == (F, F) and bias.shape == (F,)

    # Lane-dense flattening: (C, T, F) -> (n_rows, L) with L = 128 when F | 128
    # and the row count comes out integral; otherwise fall back to L = F
    # (still correct, just narrower lanes).
    if _LANES % F == 0 and (C * T) % (_LANES // F) == 0:
        reps = _LANES // F
    else:
        reps = 1
    L = F * reps
    n_rows = (C * T) // reps
    inv_ct = 1.0 / float(C * T)

    # Fold the (C,T)-mean, the Linear, and the lane replication into one matrix:
    #   W_big[l1, l2] = weight[l2 % F, l1 % F] / (C*T),  bias_big[l2] = bias[l2 % F]
    w_big = (jnp.tile(jnp.transpose(weight), (reps, reps)).astype(jnp.float32) * inv_ct)
    b_big = jnp.tile(bias, (reps,)).reshape(1, L).astype(jnp.float32)

    x_flat = x.reshape(B, n_rows, L)

    # Batch tiling: biggest divisor of B whose block stays under the VMEM cap.
    per_batch_bytes = n_rows * L * jnp.dtype(x.dtype).itemsize
    b_tile = _largest_divisor_le(B, max(1, block_bytes_cap // max(1, per_batch_bytes)))
    grid = (B // b_tile,)

    out_flat = pl.pallas_call(
        _freq_attn_kernel,
        out_shape=jax.ShapeDtypeStruct((B, n_rows, L), x.dtype),
        grid_spec=pltpu.PrefetchScalarGridSpec(
            num_scalar_prefetch=0,
            grid=grid,
            in_specs=[
                pl.BlockSpec((b_tile, n_rows, L), lambda i: (i, 0, 0)),
                pl.BlockSpec((L, L), lambda i: (0, 0)),
                pl.BlockSpec((1, L), lambda i: (0, 0)),
            ],
            out_specs=pl.BlockSpec((b_tile, n_rows, L), lambda i: (i, 0, 0)),
        ),
        compiler_params=pltpu.CompilerParams(
            dimension_semantics=("parallel",),
            vmem_limit_bytes=32 * 1024 * 1024,
        ),
    )(x_flat, w_big, b_big)

    return out_flat.reshape(B, C, T, F)


def freq_attn_ref(x, weight, bias):
    lin = jnp.einsum("bctf,gf->bctg", x, weight) + bias
    attn = jax.nn.sigmoid(lin.mean(axis=1).mean(axis=1))[:, None, None, :]
    return x * attn


if __name__ == "__main__":
    key = jax.random.PRNGKey(0)
    k_x, k_w, k_b = jax.random.split(key, 3)

    B, C, T, F = 2, 4, 16, 16  # freq_num = 16
    x = jax.random.normal(k_x, (B, C, T, F), dtype=jnp.float32)

    # Deterministic params, same scheme as torch.nn.Linear default init:
    # U(-1/sqrt(freq_num), 1/sqrt(freq_num))
    bound = 1.0 / jnp.sqrt(jnp.float32(F))
    weight = jax.random.uniform(k_w, (F, F), jnp.float32, -bound, bound)
    bias = jax.random.uniform(k_b, (F,), jnp.float32, -bound, bound)

    out = jax.block_until_ready(freq_attn(x, weight, bias))

    ref = freq_attn_ref(x, weight, bias)
    assert out.shape == (B, C, T, F)
    # Mean is commuted with the Linear in the kernel, so summation order differs
    # from the reference at rounding level only.
    assert jnp.allclose(out, ref, atol=2e-5, rtol=2e-5), \
        float(jnp.max(jnp.abs(out - ref)))

    print("KERNEL_OK")
</pallas_src>

<mosaic_0001>
module attributes {stable_mosaic.version = 11 : i64} {
  func.func @_freq_attn_kernel(%arg0: i32, %arg1: memref<2x8x128xf32, #tpu.memory_space<vmem>>, %arg2: memref<128x128xf32, #tpu.memory_space<vmem>>, %arg3: memref<1x128xf32, #tpu.memory_space<vmem>>, %arg4: memref<2x8x128xf32, #tpu.memory_space<vmem>>) attributes {dimension_semantics = [#tpu.dimension_semantics<parallel>], iteration_bounds = array<i64: 1>, scalar_prefetch = 0 : i64, scratch_operands = 0 : i64, tpu.core_type = #tpu.core_type<tc>, window_params = [{transform_indices = @transform_0, window_bounds = array<i64: 2, 8, 128>}, {pipeline_mode = #tpu.pipeline_mode<synchronous>, transform_indices = @transform_1, window_bounds = array<i64: 128, 128>}, {pipeline_mode = #tpu.pipeline_mode<synchronous>, transform_indices = @transform_2, window_bounds = array<i64: 1, 128>}, {transform_indices = @transform_3, window_bounds = array<i64: 2, 8, 128>}]} {
    %c0 = arith.constant 0 : index
    %c0_0 = arith.constant 0 : index
    %c0_1 = arith.constant 0 : index
    %0 = vector.load %arg1[%c0, %c0_0, %c0_1] : memref<2x8x128xf32, #tpu.memory_space<vmem>>, vector<2x8x128xf32>
    %cst = arith.constant dense<0.000000e+00> : vector<2x128xf32>
    %1 = vector.multi_reduction <add>, %0, %cst [1] : vector<2x8x128xf32> to vector<2x128xf32>
    %c0_2 = arith.constant 0 : index
    %c0_3 = arith.constant 0 : index
    %2 = vector.load %arg2[%c0_2, %c0_3] : memref<128x128xf32, #tpu.memory_space<vmem>>, vector<128x128xf32>
    %cst_4 = arith.constant dense<0.000000e+00> : vector<2x128xf32>
    %3 = tpu.matmul %1, %2, %cst_4 {dimension_numbers = #tpu.dot_dimension_numbers<[1], [0], [0], [1], [0, 0, 1, 1], [], []>} : vector<2x128xf32>, vector<128x128xf32>, vector<2x128xf32> -> vector<2x128xf32>
    %c0_5 = arith.constant 0 : index
    %c0_6 = arith.constant 0 : index
    %4 = vector.load %arg3[%c0_5, %c0_6] : memref<1x128xf32, #tpu.memory_space<vmem>>, vector<1x128xf32>
    %5 = vector.broadcast %4 : vector<1x128xf32> to vector<2x128xf32>
    %6 = arith.addf %3, %5 : vector<2x128xf32>
    %cst_7 = arith.constant 0.000000e+00 : f32
    %7 = vector.broadcast %cst_7 : f32 to vector<2x128xf32>
    %8 = arith.subf %7, %6 : vector<2x128xf32>
    %9 = math.exp %8 : vector<2x128xf32>
    %cst_8 = arith.constant 1.000000e+00 : f32
    %10 = vector.broadcast %cst_8 : f32 to vector<2x128xf32>
    %11 = arith.addf %10, %9 : vector<2x128xf32>
    %cst_9 = arith.constant 1.000000e+00 : f32
    %12 = vector.broadcast %cst_9 : f32 to vector<2x128xf32>
    %13 = arith.divf %12, %11 : vector<2x128xf32>
    %14 = vector.shape_cast %13 : vector<2x128xf32> to vector<2x1x128xf32>
    %15 = vector.broadcast %14 : vector<2x1x128xf32> to vector<2x8x128xf32>
    %16 = arith.mulf %0, %15 : vector<2x8x128xf32>
    %c0_10 = arith.constant 0 : index
    %c0_11 = arith.constant 0 : index
    %c0_12 = arith.constant 0 : index
    %17 = vector.load %arg4[%c0_10, %c0_11, %c0_12] : memref<2x8x128xf32, #tpu.memory_space<vmem>>, vector<2x8x128xf32>
    tpu.vector_store %arg4[%c0_10, %c0_11, %c0_12], %16 {strides = array<i32>} : memref<2x8x128xf32, #tpu.memory_space<vmem>>, vector<2x8x128xf32>,
    return
  }
  func.func @transform_0(%arg0: i32) -> (i32, i32, i32) {
    %c0_i32 = arith.constant 0 : i32
    %c0_i32_0 = arith.constant 0 : i32
    %c0_i32_1 = arith.constant 0 : i32
    return %arg0, %c0_i32, %c0_i32_0 : i32, i32, i32
  }
  func.func @transform_1(%arg0: i32) -> (i32, i32) {
    %c0_i32 = arith.constant 0 : i32
    %c0_i32_0 = arith.constant 0 : i32
    %c0_i32_1 = arith.constant 0 : i32
    return %c0_i32, %c0_i32_0 : i32, i32
  }
  func.func @transform_2(%arg0: i32) -> (i32, i32) {
    %c0_i32 = arith.constant 0 : i32
    %c0_i32_0 = arith.constant 0 : i32
    %c0_i32_1 = arith.constant 0 : i32
    return %c0_i32, %c0_i32_0 : i32, i32
  }
  func.func @transform_3(%arg0: i32) -> (i32, i32, i32) {
    %c0_i32 = arith.constant 0 : i32
    %c0_i32_0 = arith.constant 0 : i32
    %c0_i32_1 = arith.constant 0 : i32
    return %arg0, %c0_i32, %c0_i32_0 : i32, i32, i32
  }
}

</mosaic_0001>

<bundles_post_ra>
// kernel: tpu_custom_call.1
= control target key start
LH: loop header
LB: loop body
LE: loop exit
PB: predicated region body
PF: predicated region fallthrough
CT: control target
= control target key end

     0   :  { %8 = vsyncpa [#allocation3], 0  ;;  %s299_s0 = inlined_call_operand.hbm [shape: f32[2,8,128], index: 0, kind: input, shape index: {}]   ;;  %s300_s1 = inlined_call_operand.hbm [shape: f32[128,128], index: 1, kind: input, shape index: {}]   ;;  %s301_s2 = inlined_call_operand.vmem [shape: f32[1,128], index: 2, kind: input, shape index: {}]   ;;  %s302_s3 = inlined_call_operand.hbm [shape: f32[2,8,128], index: 3, kind: output, shape index: {}]  }
   0x1   :  { %9 = vsyncpa [#allocation6], 0 }
   0x2   :  { %10 = vsyncpa [#allocation4], 0  ;;  %s15_s14 = sshll.u32 %s299_s0, 4  ;;  %s243_s15 = smov [#allocation2]   ;;  %s16_s14 = int_to_ptr.hbm [resolvable:$true] %s15_s14 }
   0x3   :  { %s17_s16 = sshll.u32 %s243_s15, 4  ;;  %s28_s19 = sshll.u32 %s300_s1, 4  ;;  %s18_s16 = int_to_ptr.vmem [resolvable:$true] %s17_s16  ;;  %s29_s19 = int_to_ptr.hbm [resolvable:$true] %s28_s19 }
   0x4   :  { %s244_s20 = smov 128   ;;  %s245_s21 = smov 8  }
   0x5   :  { %23 = dma.hbm_to_vmem [thread:$0]  %s16_s14, 256, %s18_s16, [#allocation3], %s244_s20, %s244_s20, %s245_s21  }
   0x6   :  { %s246_s22 = smov [#allocation5]  }
   0x7   :  { %s30_s23 = sshll.u32 %s246_s22, 4  ;;  %s31_s23 = int_to_ptr.vmem [resolvable:$true] %s30_s23 }
   0x8   :  { %36 = dma.hbm_to_vmem [thread:$0]  %s29_s19, 2048, %s31_s23, [#allocation6], %s244_s20, %s244_s20, %s245_s21  }
   0x9   :  { %237 = dma.done.wait [#allocation3], 256  }
   0xa   :  { %238 = vsyncadd [#allocation3], 4294967040 }
   0xb   :  { %239 = dma.done.wait [#allocation6], 2048  }
   0xc   :  { %240 = vsyncadd [#allocation6], 4294965248  ;;  %v76_v0 = vld [vmem:[#allocation5 + $0x78] sm:$0xff]  ;;  %v75_v1 = vld [vmem:[#allocation5 + $0x70] sm:$0xff]  ;;  %vm83_vm0 = vcmask 1041409   ;;  %s141_s27 = sshll.u32 %s302_s3, 4  ;;  %s142_s27 = int_to_ptr.hbm [resolvable:$true] %s141_s27 }
   0xd   :  { %86 = vmatpush.msra.mxu0 %v76_v0  ;;  %v74_v2 = vld [vmem:[#allocation5 + $0x68] sm:$0xff]  ;;  %v73_v3 = vld [vmem:[#allocation5 + $0x60] sm:$0xff]  ;;  %v280_v4 = vld [vmem:[#allocation2] sm:$0xff] }
   0xe   :  { %v282_v5 = vld [vmem:[#allocation2 + $0x8] sm:$0xff]  ;;  %v49_v7 = vrot.slane %v280_v4, 4  ;;  %v71_v9 = vld [vmem:[#allocation5 + $0x50] sm:$0xff]  ;;  %v70_v12 = vld [vmem:[#allocation5 + $0x48] sm:$0xff] }
   0xf   :  { %87 = vmatpush.msra.mxu0 %v75_v1  ;;  %v72_v6 = vld [vmem:[#allocation5 + $0x58] sm:$0xff]  ;;  %v55_v8 = vrot.slane %v282_v5, 4  ;;  %v69_v13 = vld [vmem:[#allocation5 + $0x40] sm:$0xff]  ;;  %v67_v17 = vld [vmem:[#allocation5 + $0x30] sm:$0xff] }
  0x10   :  { %v50_v10 = vadd.f32 %v49_v7, %v280_v4  ;;  %v68_v16 = vld [vmem:[#allocation5 + $0x38] sm:$0xff]  ;;  %v66_v20 = vld [vmem:[#allocation5 + $0x28] sm:$0xff]  ;;  %v65_v21 = vld [vmem:[#allocation5 + $0x20] sm:$0xff] }
  0x11   :  { %88 = vmatpush.msra.mxu0 %v74_v2  ;;  %v56_v11 = vadd.f32 %v55_v8, %v282_v5  ;;  %v64_v24 = vld [vmem:[#allocation5 + $0x18] sm:$0xff]  ;;  %v63_v25 = vld [vmem:[#allocation5 + $0x10] sm:$0xff]  ;;  %v62_v28 = vld [vmem:[#allocation5 + $0x8] sm:$0xff] }
  0x12   :  { %v51_v14 = vrot.slane %v50_v10, 2  ;;  %v61_v29 = vld [vmem:[#allocation5] sm:$0xff]  ;;  %v160_v31 = vld [vmem:[%s301_s2] ss:$0 sm:$0xff]  ;;  %s247_s2 = smov [#allocation7]  }
  0x13   :  { %89 = vmatpush.msra.mxu0 %v73_v3  ;;  %v57_v15 = vrot.slane %v56_v11, 2  ;;  %s139_s24 = sshll.u32 %s247_s2, 4  ;;  %s140_s24 = int_to_ptr.vmem [resolvable:$true] %s139_s24 }
  0x14   :  { %v52_v18 = vadd.f32 %v51_v14, %v50_v10 }
  0x15   :  { %90 = vmatpush.msra.mxu0 %v72_v6  ;;  %v58_v19 = vadd.f32 %v57_v15, %v56_v11 }
  0x16   :  { %v53_v22 = vrot.slane %v52_v18, 1 }
  0x17   :  { %91 = vmatpush.msra.mxu0 %v71_v9  ;;  %v59_v23 = vrot.slane %v58_v19, 1 }
  0x18   :  { %v54_v26 = vadd.f32 %v53_v22, %v52_v18 }
  0x19   :  { %92 = vmatpush.msra.mxu0 %v70_v12  ;;  %v60_v27 = vadd.f32 %v59_v23, %v58_v19 }
  0x1b   :  { %93 = vmatpush.msra.mxu0 %v69_v13  ;;  %v84_v30 = vsel %vm83_vm0, %v60_v27, %v54_v26 }
  0x1d   :  { %94 = vmatpush.msra.mxu0 %v68_v16 }
  0x1f   :  { %95 = vmatpush.msra.mxu0 %v67_v17 }
  0x21   :  { %96 = vmatpush.msra.mxu0 %v66_v20 }
  0x23   :  { %97 = vmatpush.msra.mxu0 %v65_v21 }
  0x25   :  { %98 = vmatpush.msra.mxu0 %v64_v24 }
  0x27   :  { %99 = vmatpush.msra.mxu0 %v63_v25 }
  0x29   :  { %100 = vmatpush.msra.mxu0 %v62_v28 }
  0x2b   :  { %101 = vmatpush.msra.mxu0 %v61_v29 }
  0x2c   :  { %102 = vmatmul.f32.vlgmr.msra.gmra.mxu0 %v84_v30 }
  0xa9   :  { %v103_v32 = vpop.f32.mrf.mxu0 }
  0xaa   :  { %v104_v33 = vadd.f32 %v160_v31, %v103_v32 }
  0xac   :  { %v106_v34 = vsub.f32 0.0, %v104_v33 }
  0xae   :  { %v107_v35 = vmul.f32 1.442695, %v106_v34 }
  0xb0   :  { %161 = vpow2.f32 %v107_v35 }
  0xb6   :  { %v162_v36 = vpop.eup %161 }
  0xb7   :  { %v109_v37 = vadd.f32 1.0, %v162_v36 }
  0xb9   :  { %163 = vrcp.f32 %v109_v37  ;;  %v121_v41 = vand.u32 2147483648, %v109_v37  ;;  %v119_v43 = vand.u32 2147483647, %v109_v37  ;;  %vm115_vm2 = vweird.f32 %v109_v37 }
  0xbb   :  { %v122_v45 = vor.u32 1.1754944e-38, %v121_v41  ;;  %vm120_vm4 = vcmp.eq.f32.partialorder %v119_v43, 8.507059e+37 }
  0xbf   :  { %v164_v38 = vpop.eup %163 }
  0xc0   :  { %v111_v39 = vmul.f32 %v164_v38, %v109_v37  ;;  %vm116_vm1 = vweird.f32 %v164_v38 }
  0xc1   :  { %vm117_vm3 = vmor %vm115_vm2, %vm116_vm1 }
  0xc2   :  { %v112_v40 = vsub.f32 1.0, %v111_v39 }
  0xc4   :  { %v113_v42 = vmul.f32 %v164_v38, %v112_v40 }
  0xc6   :  { %v114_v44 = vadd.f32 %v164_v38, %v113_v42 }
  0xc8   :  { %v118_v46 = vsel %vm117_vm3, %v164_v38, %v114_v44 }
  0xc9   :  { %v123_v47 = vsel %vm120_vm4, %v122_v45, %v118_v46 }
  0xca   :  { %v126_v48 = vrot.slane %v123_v47, 1  ;;  %v127_v49 = vperm.slane %v123_v47, 0 }
  0xcc   :  { %v128_v50 = vperm.slane %v126_v48, 0  ;;  %v131_v51 = vmul.f32 %v127_v49, %v280_v4 }
  0xce   :  { %v132_v52 = vmul.f32 %v128_v50, %v282_v5  ;;  %133 = vst [vmem:[#allocation7] sm:$0xff] %v131_v51 }
  0xd0   :  { %134 = vst [vmem:[#allocation7 + $0x8] sm:$0xff] %v132_v52 }
  0xd1   :  { %147 = dma.vmem_to_hbm [thread:$0]  %s140_s24, 256, %s142_s27, [#allocation4], %s244_s20, %s244_s20, %s245_s21  }
  0xd2   :  { %241 = dma.done.wait [#allocation4], 256  }
  0xd3   :  { %242 = vsyncadd [#allocation4], 4294967040 }
  0xd4   :  { %152 = vsyncpa [#allocation3], 1 }
  0xd5   :  { %153 = vsyncpa [#allocation6], 1 }
  0xd6   :  { %154 = vsyncpa [#allocation4], 1 }

</bundles_post_ra>
